<compile_context>
chip_gen: v5e
topology: v5e:2x2
jax: 0.10.0
libtpu: 0.0.40
codegen_flags: <defaults>
</compile_context>

<pallas_src>
from types import SimpleNamespace

import jax
import jax.numpy as jnp
from jax import lax
from jax.experimental import pallas as pl
from jax.experimental.pallas import tpu as pltpu

EPS = 1e-8
# Fits v7x's 64 MiB/TC, lifts v5e's 16 MiB default scoped limit, safe on v6e.
_VMEM_LIMIT = 48 * 1024 * 1024


# ----------------------------------------------------------------------------
# Kernel 1: M-tiled matmul (text-encoder projection).
# bf16 MXU operands cast IN-KERNEL (inputs arrive f32), f32 accumulation.
# ----------------------------------------------------------------------------
def _matmul_kernel(x_ref, w_ref, o_ref):
    o_ref[...] = jnp.dot(x_ref[...].astype(jnp.bfloat16),
                         w_ref[...].astype(jnp.bfloat16),
                         preferred_element_type=jnp.float32)


def pallas_matmul(x, w, tm=512):
    M, K = x.shape
    _, N = w.shape
    tm = min(tm, M)              # tm==M (equals full dim) or a multiple of 8
    return pl.pallas_call(
        _matmul_kernel,
        out_shape=jax.ShapeDtypeStruct((M, N), jnp.float32),
        grid=(pl.cdiv(M, tm),),
        in_specs=[pl.BlockSpec((tm, K), lambda i: (i, 0)),
                  pl.BlockSpec((K, N), lambda i: (0, 0))],
        out_specs=pl.BlockSpec((tm, N), lambda i: (i, 0)),
        compiler_params=pltpu.CompilerParams(
            dimension_semantics=("parallel",),
            vmem_limit_bytes=_VMEM_LIMIT),
    )(x, w)


# ----------------------------------------------------------------------------
# Kernel 2: fused image encoder — per image: NCHW -> [R, C] relayout (in VMEM,
# no HBM round trip), projection to [R, D] on the MXU, and the region mean for
# the sentence feature as a second output.  Grid over batch, "parallel".
# ----------------------------------------------------------------------------
def _image_encoder_kernel(x_ref, w_ref, fw_ref, fs_ref):
    x = x_ref[0]                                        # [C, H, W] f32
    C, H, W = x.shape
    x2 = x.reshape(C, H * W).astype(jnp.bfloat16)       # relayout stays in VMEM
    w = w_ref[...].astype(jnp.bfloat16)                 # [C, D]
    fw = lax.dot_general(x2, w, (((0,), (0,)), ((), ())),
                         preferred_element_type=jnp.float32)    # [R, D]
    fw_ref[0] = fw
    fs_ref[0] = jnp.mean(fw, axis=0, keepdims=True)     # fused region mean


# ----------------------------------------------------------------------------
# Kernel 3: sentence-level cosine score matrix (sent_loss hot path)
#   scores[i, j] = gamma3 * <img_s[i], txt_s[j]> / (||img_s[i]|| * ||txt_s[j]||)
# Rows pre-scaled by rsqrt (EUP, f32), cast to bf16, ONE MXU matmul.
# ----------------------------------------------------------------------------
def _make_sent_scores_kernel(gamma3):
    def kernel(img_ref, txt_ref, o_ref):
        img = img_ref[...]                                      # [B, D] f32
        txt = txt_ref[...]                                      # [B, D] f32
        img_n = (img * lax.rsqrt(jnp.maximum(
            jnp.sum(img * img, axis=1, keepdims=True), EPS * EPS))
                 ).astype(jnp.bfloat16)
        txt_n = (txt * lax.rsqrt(jnp.maximum(
            jnp.sum(txt * txt, axis=1, keepdims=True), EPS * EPS))
                 ).astype(jnp.bfloat16)
        o_ref[...] = gamma3 * lax.dot_general(
            img_n, txt_n, (((1,), (1,)), ((), ())),
            preferred_element_type=jnp.float32)                 # [B, B]
    return kernel


def sent_scores(img_f_s, text_f_s, gamma3):
    B, D = img_f_s.shape
    return pl.pallas_call(
        _make_sent_scores_kernel(float(gamma3)),
        out_shape=jax.ShapeDtypeStruct((B, B), jnp.float32),
        grid=(1,),
        in_specs=[pl.BlockSpec((B, D), lambda i: (0, 0)),
                  pl.BlockSpec((B, D), lambda i: (0, 0))],
        out_specs=pl.BlockSpec((B, B), lambda i: (0, 0)),
        compiler_params=pltpu.CompilerParams(
            vmem_limit_bytes=_VMEM_LIMIT),
    )(img_f_s, text_f_s)


# ----------------------------------------------------------------------------
# Kernel 4: word-level attention + similarities (words_loss hot path)
# grid = (caption blocks ["parallel"], images ["arbitrary", bi = 1]).
# Per grid step (one caption block x one image):
#   - ONE MXU matmul (jc*Tp, D) x (D, R): attention logits with R on lanes
#   - word-softmax (sublane-segment reduce over Tp) and gamma1 region-softmax
#     (lane reduce over R), both with exact divides, all elementwise math f32
#     with R on the 128-wide lane axis
#   - ONE MXU matmul (jc*Tp, R) x (R, D): weighted contexts for all captions
#   - cosine via rsqrt (numerator recycled from the raw logits), masked
#     exp/log pooling over valid words
#   - the [jc, 1] column of similarities for this image is merged into the
#     resident [jc, B_img] output block with an iota select (no dynamic-lane
#     stores); the block is written back to HBM lane-dense once per caption
#     block.
# ----------------------------------------------------------------------------
def _make_words_sim_kernel(gamma1, gamma2):
    def kernel(ctx_ref, words_ref, mask_ref, o_ref):
        i = pl.program_id(1)                         # image index (inner axis)
        jc, Tp, D = words_ref.shape
        R = ctx_ref.shape[1]
        n_img = o_ref.shape[1]

        ctx = ctx_ref[0].astype(jnp.bfloat16)        # [R, D]  MXU operand
        words = words_ref[...]                       # [jc, Tp, D] f32
        mask = mask_ref[...]                         # [jc*Tp, 1] f32
        words2d = words.reshape(jc * Tp, D)          # free: Tp % 8 == 0
        words_bf = words2d.astype(jnp.bfloat16)

        # Attention logits for every (caption, word, region): ONE MXU matmul.
        # Regions (R) land on the lane axis for everything that follows.
        logits = lax.dot_general(
            words_bf, ctx, (((1,), (1,)), ((), ())),
            preferred_element_type=jnp.float32)      # [jc*Tp, R]

        masked = jnp.where(mask > 0.0, logits, jnp.float32(-1e9))

        # Softmax over words (per caption, per region): sublane-segment reduce
        # via a tile-aligned [jc, Tp, R] view.  Exact divide (loss parity).
        m3 = masked.reshape(jc, Tp, R)
        m1 = jnp.max(m3, axis=1, keepdims=True)
        e1 = jnp.exp(m3 - m1)
        attn1 = (e1 / jnp.sum(e1, axis=1, keepdims=True)).reshape(jc * Tp, R)

        # gamma1-scaled softmax over regions (lane-axis reduce), exact divide.
        a2 = attn1 * gamma1
        m2 = jnp.max(a2, axis=1, keepdims=True)
        e2 = jnp.exp(a2 - m2)
        attn2 = e2 / jnp.sum(e2, axis=1, keepdims=True)          # [jc*Tp, R]

        # Weighted contexts for all captions/words: ONE MXU matmul, f32 acc.
        wctx = lax.dot_general(
            attn2.astype(jnp.bfloat16), ctx, (((1,), (0,)), ((), ())),
            preferred_element_type=jnp.float32)                  # [jc*Tp, D]

        # Cosine similarity per word.  Numerator recycles the raw (pre-mask)
        # logits:  sum_r attn2[w,r] * (word_w . ctx_r) == word_w . wctx_w.
        num = jnp.sum(attn2 * logits, axis=1, keepdims=True)     # [jc*Tp, 1]
        wn2 = jnp.sum(words2d * words2d, axis=1, keepdims=True)  # [jc*Tp, 1]
        cn2 = jnp.sum(wctx * wctx, axis=1, keepdims=True)        # [jc*Tp, 1]
        cos = num * lax.rsqrt(jnp.maximum(wn2 * cn2, EPS * EPS))

        # row_sim = log( sum over valid words of exp(gamma2 * cos) )
        e = jnp.exp(gamma2 * cos) * mask                         # [jc*Tp, 1]
        s = jnp.sum(e.reshape(jc, Tp, 1), axis=1)                # [jc, 1]
        sims = jnp.log(jnp.maximum(s, EPS))                      # [jc, 1]

        # Merge this image's column into the resident [jc, n_img] output
        # block (static lane ops only; no dynamic-lane stores).
        @pl.when(i == 0)
        def _():
            o_ref[...] = jnp.zeros_like(o_ref)
        col = lax.broadcasted_iota(jnp.int32, (jc, n_img), 1)
        o_ref[...] = jnp.where(col == i, sims, o_ref[...])
    return kernel


def _pick_cap_block(B):
    # Caption block jc must divide B.  Prefer 8: keeps the output / mask block
    # sublane-aligned and (at B=48) gives an even 'parallel' step count for
    # v7x's two TensorCores.
    for jc in (8, 16, 24, 32):
        if B % jc == 0:
            return jc
    return B


def words_similarities(img_f_w, text_f_w, caps_len, gamma1, gamma2):
    """Returns sims of shape [B_cap, B_img]."""
    B, R, D = img_f_w.shape
    _, T, _ = text_f_w.shape
    Tp = ((T + 7) // 8) * 8                   # pad words to a sublane multiple
    if Tp != T:
        text_f_w = jnp.pad(text_f_w, ((0, 0), (0, Tp - T), (0, 0)))
    mask = (jnp.arange(Tp)[None, :] < caps_len[:, None]).astype(jnp.float32)
    mask = mask.reshape(B * Tp, 1)            # one validity flag per word row
    jc = _pick_cap_block(B)
    return pl.pallas_call(
        _make_words_sim_kernel(float(gamma1), float(gamma2)),
        out_shape=jax.ShapeDtypeStruct((B, B), jnp.float32),
        grid=(B // jc, B),                    # (caption blocks, images)
        in_specs=[pl.BlockSpec((1, R, D), lambda j, i: (i, 0, 0)),    # ctx tile
                  pl.BlockSpec((jc, Tp, D), lambda j, i: (j, 0, 0)),  # captions
                  pl.BlockSpec((jc * Tp, 1), lambda j, i: (j, 0))],   # word mask
        out_specs=pl.BlockSpec((jc, B), lambda j, i: (j, 0)),  # resident over i
        compiler_params=pltpu.CompilerParams(
            dimension_semantics=("parallel", "arbitrary"),
            vmem_limit_bytes=_VMEM_LIMIT),
    )(img_f_w, text_f_w, mask)


# ----------------------------------------------------------------------------
# Loss glue (tiny B x B tensors; plain JAX)
# ----------------------------------------------------------------------------
def _apply_class_mask(scores, class_ids):
    if class_ids is None:
        return scores
    B = scores.shape[0]
    same = (class_ids[:, None] == class_ids[None, :]) & ~jnp.eye(B, dtype=bool)
    return jnp.where(same, -jnp.inf, scores)


def _cross_entropy(scores, labels):
    lse = jax.nn.logsumexp(scores, axis=1)
    picked = jnp.take_along_axis(scores, labels[:, None], axis=1)[:, 0]
    return jnp.mean(lse - picked)


def sent_loss(img_f_s, text_f_s, args, class_ids=None):
    B = img_f_s.shape[0]
    scores = sent_scores(img_f_s, text_f_s, args.gamma3)        # [B_img, B_cap]
    scores = _apply_class_mask(scores, class_ids)
    labels = jnp.arange(B)
    loss0 = _cross_entropy(scores, labels)
    loss1 = _cross_entropy(scores.T, labels)
    return loss0, loss1


def words_loss(img_f_w, text_f_w, caps_len, args, class_ids=None):
    B = text_f_w.shape[0]
    sims_ci = words_similarities(img_f_w, text_f_w, caps_len,
                                 args.gamma1, args.gamma2)      # [B_cap, B_img]
    sims = sims_ci.T * args.gamma3                              # [B_img, B_cap]
    sims = _apply_class_mask(sims, class_ids)
    labels = jnp.arange(B)
    loss0 = _cross_entropy(sims, labels)
    loss1 = _cross_entropy(sims.T, labels)
    return loss0, loss1, None


# ----------------------------------------------------------------------------
# Synthetic encoders (deterministic, linear) — see TODO(synk) at top.
# ----------------------------------------------------------------------------
class ImageEncoder:
    def __init__(self, in_ch, emb_dim, key):
        self.w = 0.02 * jax.random.normal(key, (in_ch, emb_dim), jnp.float32)

    def __call__(self, imgs):                      # imgs: NCHW [B, C, H, W]
        B, C, H, W = imgs.shape
        D = self.w.shape[1]
        R = H * W
        img_f_w, img_f_s3 = pl.pallas_call(
            _image_encoder_kernel,
            out_shape=(jax.ShapeDtypeStruct((B, R, D), jnp.float32),
                       jax.ShapeDtypeStruct((B, 1, D), jnp.float32)),
            grid=(B,),
            in_specs=[pl.BlockSpec((1, C, H, W), lambda b: (b, 0, 0, 0)),
                      pl.BlockSpec((C, D), lambda b: (0, 0))],
            out_specs=(pl.BlockSpec((1, R, D), lambda b: (b, 0, 0)),
                       pl.BlockSpec((1, 1, D), lambda b: (b, 0, 0))),
            compiler_params=pltpu.CompilerParams(
                dimension_semantics=("parallel",),
                vmem_limit_bytes=_VMEM_LIMIT),
        )(imgs, self.w)
        return img_f_w, img_f_s3[:, 0, :]          # [B, R, D], [B, D]


class TextEncoder:
    def __init__(self, vocab, emb_in, emb_dim, key):
        k1, k2 = jax.random.split(key)
        self.embed = 0.02 * jax.random.normal(k1, (vocab, emb_in), jnp.float32)
        self.w = 0.02 * jax.random.normal(k2, (emb_in, emb_dim), jnp.float32)

    def __call__(self, caps, caps_len):            # caps: [B, T] int32
        B, T = caps.shape
        e = jnp.take(self.embed, caps, axis=0).reshape(B * T, -1)
        text_f_w = pallas_matmul(e, self.w).reshape(B, T, -1)      # [B, T, D]
        mask = (jnp.arange(T)[None, :] < caps_len[:, None]).astype(jnp.float32)
        denom = jnp.maximum(jnp.sum(mask, axis=1, keepdims=True), 1.0)
        text_f_s = jnp.sum(text_f_w * mask[:, :, None], axis=1) / denom  # [B, D]
        return text_f_w, text_f_s


# ----------------------------------------------------------------------------
# DAMSM module (forward pass only)
# ----------------------------------------------------------------------------
class DAMSM:
    def __init__(self, text_encoder, image_encoder, is_bert=False):
        self.text_encoder = text_encoder
        self.image_encoder = image_encoder
        self.is_bert = is_bert

    def forward(self, imgs, caps, caps_len, args, class_ids=None, bert_mask=None):
        img_f_w, img_f_s = self.image_encoder(imgs)
        if self.is_bert:
            text_f_w, text_f_s = self.text_encoder(caps, caps_len, bert_mask)
        else:
            text_f_w, text_f_s = self.text_encoder(caps, caps_len)
        s_loss0, s_loss1 = sent_loss(img_f_s, text_f_s, args, class_ids=class_ids)
        w_loss0, w_loss1, _ = words_loss(img_f_w, text_f_w, caps_len, args,
                                         class_ids=class_ids)
        return w_loss0, w_loss1, s_loss0, s_loss1


# ----------------------------------------------------------------------------
if __name__ == "__main__":
    B, C, H, W = 2, 4, 4, 4          # R = H*W = 16 regions
    T, V, E_IN, D = 8, 20, 16, 32    # seq len, vocab, embed-in, DAMSM dim
    # NOTE: real DAMSM uses D=256, R=289, B=48 (full lane/MXU utilization).

    args = SimpleNamespace(gamma1=4.0, gamma2=5.0, gamma3=10.0)

    key = jax.random.PRNGKey(0)
    k_img, k_cap, k_ie, k_te = jax.random.split(key, 4)
    imgs = jax.random.normal(k_img, (B, C, H, W), jnp.float32)
    caps = jax.random.randint(k_cap, (B, T), 0, V).astype(jnp.int32)
    caps_len = jnp.array([T, 5], dtype=jnp.int32)

    image_encoder = ImageEncoder(C, D, k_ie)
    text_encoder = TextEncoder(V, E_IN, D, k_te)
    model = DAMSM(text_encoder, image_encoder, is_bert=False)

    w_loss0, w_loss1, s_loss0, s_loss1 = model.forward(
        imgs, caps, caps_len, args, class_ids=None)
    jax.block_until_ready((w_loss0, w_loss1, s_loss0, s_loss1))

    assert all(bool(jnp.isfinite(x)) for x in (w_loss0, w_loss1, s_loss0, s_loss1))
    print("KERNEL_OK")
</pallas_src>

<mosaic_0001>
module attributes {stable_mosaic.version = 11 : i64} {
  func.func @_image_encoder_kernel(%arg0: i32, %arg1: memref<1x4x4x4xf32, #tpu.memory_space<vmem>>, %arg2: memref<4x32xf32, #tpu.memory_space<vmem>>, %arg3: memref<1x16x32xf32, #tpu.memory_space<vmem>>, %arg4: memref<1x1x32xf32, #tpu.memory_space<vmem>>) attributes {dimension_semantics = [#tpu.dimension_semantics<parallel>], iteration_bounds = array<i64: 2>, scalar_prefetch = 0 : i64, scratch_operands = 0 : i64, tpu.core_type = #tpu.core_type<tc>, window_params = [{transform_indices = @transform_0, window_bounds = array<i64: 1, 4, 4, 4>}, {pipeline_mode = #tpu.pipeline_mode<synchronous>, transform_indices = @transform_1, window_bounds = array<i64: 4, 32>}, {transform_indices = @transform_2, window_bounds = array<i64: 1, 16, 32>}, {transform_indices = @transform_3, window_bounds = array<i64: 1, 1, 32>}]} {
    %c0 = arith.constant 0 : index
    %c0_0 = arith.constant 0 : index
    %c0_1 = arith.constant 0 : index
    %c0_2 = arith.constant 0 : index
    %0 = vector.load %arg1[%c0, %c0_0, %c0_1, %c0_2] : memref<1x4x4x4xf32, #tpu.memory_space<vmem>>, vector<1x4x4x4xf32>
    %1 = vector.shape_cast %0 : vector<1x4x4x4xf32> to vector<4x4x4xf32>
    %2 = vector.shape_cast %1 : vector<4x4x4xf32> to vector<4x16xf32>
    %3 = arith.truncf %2 : vector<4x16xf32> to vector<4x16xbf16>
    %c0_3 = arith.constant 0 : index
    %c0_4 = arith.constant 0 : index
    %4 = vector.load %arg2[%c0_3, %c0_4] : memref<4x32xf32, #tpu.memory_space<vmem>>, vector<4x32xf32>
    %5 = arith.truncf %4 : vector<4x32xf32> to vector<4x32xbf16>
    %cst = arith.constant dense<0.000000e+00> : vector<16x32xf32>
    %6 = tpu.matmul %3, %5, %cst {dimension_numbers = #tpu.dot_dimension_numbers<[0], [0], [1], [1], [0, 1, 1, 1], [], []>} : vector<4x16xbf16>, vector<4x32xbf16>, vector<16x32xf32> -> vector<16x32xf32>
    %c0_5 = arith.constant 0 : index
    %c0_6 = arith.constant 0 : index
    %c0_7 = arith.constant 0 : index
    %7 = vector.load %arg3[%c0_5, %c0_6, %c0_7] : memref<1x16x32xf32, #tpu.memory_space<vmem>>, vector<1x16x32xf32>
    %8 = vector.shape_cast %7 : vector<1x16x32xf32> to vector<16x32xf32>
    %9 = vector.shape_cast %6 : vector<16x32xf32> to vector<1x16x32xf32>
    tpu.vector_store %arg3[%c0_5, %c0_6, %c0_7], %9 {strides = array<i32>} : memref<1x16x32xf32, #tpu.memory_space<vmem>>, vector<1x16x32xf32>,
    %cst_8 = arith.constant dense<0.000000e+00> : vector<32xf32>
    %10 = vector.multi_reduction <add>, %6, %cst_8 [0] : vector<16x32xf32> to vector<32xf32>
    %11 = vector.shape_cast %10 : vector<32xf32> to vector<1x32xf32>
    %cst_9 = arith.constant 1.600000e+01 : f32
    %12 = vector.broadcast %cst_9 : f32 to vector<1x32xf32>
    %13 = arith.divf %11, %12 : vector<1x32xf32>
    %c0_10 = arith.constant 0 : index
    %c0_11 = arith.constant 0 : index
    %c0_12 = arith.constant 0 : index
    %14 = vector.load %arg4[%c0_10, %c0_11, %c0_12] : memref<1x1x32xf32, #tpu.memory_space<vmem>>, vector<1x1x32xf32>
    %15 = vector.shape_cast %14 : vector<1x1x32xf32> to vector<1x32xf32>
    %16 = vector.shape_cast %13 : vector<1x32xf32> to vector<1x1x32xf32>
    tpu.vector_store %arg4[%c0_10, %c0_11, %c0_12], %16 {strides = array<i32>} : memref<1x1x32xf32, #tpu.memory_space<vmem>>, vector<1x1x32xf32>,
    return
  }
  func.func @transform_0(%arg0: i32) -> (i32, i32, i32, i32) {
    %c0_i32 = arith.constant 0 : i32
    %c0_i32_0 = arith.constant 0 : i32
    %c0_i32_1 = arith.constant 0 : i32
    %c0_i32_2 = arith.constant 0 : i32
    return %arg0, %c0_i32, %c0_i32_0, %c0_i32_1 : i32, i32, i32, i32
  }
  func.func @transform_1(%arg0: i32) -> (i32, i32) {
    %c0_i32 = arith.constant 0 : i32
    %c0_i32_0 = arith.constant 0 : i32
    %c0_i32_1 = arith.constant 0 : i32
    return %c0_i32, %c0_i32_0 : i32, i32
  }
  func.func @transform_2(%arg0: i32) -> (i32, i32, i32) {
    %c0_i32 = arith.constant 0 : i32
    %c0_i32_0 = arith.constant 0 : i32
    %c0_i32_1 = arith.constant 0 : i32
    return %arg0, %c0_i32, %c0_i32_0 : i32, i32, i32
  }
  func.func @transform_3(%arg0: i32) -> (i32, i32, i32) {
    %c0_i32 = arith.constant 0 : i32
    %c0_i32_0 = arith.constant 0 : i32
    %c0_i32_1 = arith.constant 0 : i32
    return %arg0, %c0_i32, %c0_i32_0 : i32, i32, i32
  }
}

</mosaic_0001>

<bundles_post_ra>
// kernel: tpu_custom_call.1
= control target key start
LH: loop header
LB: loop body
LE: loop exit
PB: predicated region body
PF: predicated region fallthrough
CT: control target
= control target key end

     0   :  { %9 = vsyncpa [#allocation3], 0  ;;  %s931_s0 = inlined_call_operand.hbm [shape: f32[2,4,4,4], index: 0, kind: input, shape index: {}]   ;;  %s932_s1 = inlined_call_operand.hbm [shape: f32[4,32], index: 1, kind: input, shape index: {}]   ;;  %s933_s2 = inlined_call_operand.hbm [shape: f32[2,16,32], index: 2, kind: output, shape index: {0}]   ;;  %s934_s3 = inlined_call_operand.hbm [shape: f32[2,1,32], index: 3, kind: output, shape index: {1}]  }
   0x1   :  { %11 = vsyncpa [#allocation3 + $0x1], 0 }
   0x2   :  { %12 = vsyncpa [#allocation6], 0 }
   0x3   :  { %13 = vsyncpa [#allocation4], 0 }
   0x4   :  { %15 = vsyncpa [#allocation4 + $0x1], 0 }
   0x5   :  { %16 = vsyncpa [#allocation9], 0 }
   0x6   :  { %18 = vsyncpa [#allocation9 + $0x1], 0  ;;  %s761_s12 = smov 0   ;;  %s763_s13 = smov 0  }
   0x7   :  { %s765_s14 = smov 0   ;;  %s767_s15 = smov 0  }
   0x8 LB: > { %s782_s16 = sadd.s32 4294967295, %s729_s15   ;;  %s474_s17 = sadd.s32 4294967294, %s729_s15   ;;  %s729_s15 = sphi %s767_s15, %s945_s15   ;;  %s725_s14 = sphi %s765_s14, %s944_s14   ;;  %s721_s13 = sphi %s763_s13, %s943_s13   ;;  %s717_s12 = sphi %s761_s12, %s942_s12  }
   0x9   : > { %s786_s18 = sadd.s32 1, %s729_s15   ;;  %s31_s19 = sadd.s32 1, %s725_s14 }
   0xa   : > { %s28_s20 = ssub.s32 %s729_s15, %s786_s18  ;;  %p38_p0 = scmp.ne.s32.totalorder %s725_s14, %s721_s13 }
   0xb   : > { %p29_p1 = scmp.eq.s32.totalorder %s28_s20, 0  ;;  %p39_p2 = scmp.eq.s32.totalorder %s729_s15, 0 }
   0xc   : > { %p44_p3 = scmp.ne.s32.totalorder %s721_s13, %s717_s12  ;;  %p45_p4 = scmp.eq.s32.totalorder %s782_s16, 0 }
   0xd   : > { %s798_s21 = scalar_select %p29_p1, %s725_s14, %s31_s19  }
   0xe   : > { %p800_p5 = por %p39_p2, %p38_p0  ;;  %p806_p6 = por %p45_p4, %p44_p3 }
   0xf   : > { %p89_p7 = scmp.eq.s32.totalorder %s782_s16, 1  ;;  %p95_p8 = scmp.eq.s32.totalorder %s474_s17, 1 }
  0x10   : > { %p475_p9 = scmp.ge.s32.totalorder %s729_s15, 1  ;;  %p128_p10 = scmp.lt.s32.totalorder %s729_s15, 3 }
  0x11   : > { %p813_p11 = por %p89_p7, %p38_p0  ;;  %p817_p12 = por %p95_p8, %p44_p3 }
  0x12   : > { %p821_p13 = pnand %p475_p9, %p128_p10  ;;  %s140_s29 = sshll.u32 %s932_s1, 4  ;;  %s141_s29 = int_to_ptr.hbm [resolvable:$true] %s140_s29 }
  0x13   : > { %s731_s30 = smov [#allocation5]   ;;  %p519_p3 = scmp.lt.s32.totalorder %s729_s15, 2 }
  0x14   : > { %p503_p1 = pneg %p821_p13  ;;  %s142_s4 = sshll.u32 %s731_s30, 4  ;;  %s143_s4 = int_to_ptr.vmem [resolvable:$true] %s142_s4 }
  0x15   : > { %s153_s5 = sand.u32 1, %s725_s14   ;;  %p837_p7 = pnand %p519_p3, %p800_p5 }
  0x16   : > { %p504_p2 = pnand %p503_p1, %p45_p4  ;;  %s478_s7 = sshll.u32 %s153_s5, 4 }
  0x17   : > { %s491_s8 = sshll.u32 %s729_s15, 4  ;;  %s157_s19 = scalar_lea.vmem [#allocation2], %s478_s7 }
  0x18   : > { %506 = dma.hbm_to_vmem [thread:$0]  (!%p504_p2), %s141_s29, 64, %s143_s4, [#allocation6]  }
  0x19   : > { %s162_s11 = scalar_lea.hbm %s931_s0, %s491_s8  ;;  %s165_s20 = sshll.u32 %s157_s19, 4  ;;  %s166_s20 = int_to_ptr.vmem [resolvable:$true] %s165_s20 }
  0x1a   : > { %s163_s17 = sshll.u32 %s162_s11, 4  ;;  %s154_s27 = scalar_lea.sflag [#allocation3], %s153_s5  ;;  %s164_s17 = int_to_ptr.hbm [resolvable:$true] %s163_s17 }
  0x1b   : > { %s597_s28 = sshra.s32 %s164_s17, 4  ;;  %p601_p8 = pneg %p837_p7  ;;  %s598_s28 = int_to_ptr.hbm [resolvable:$true] %s597_s28 }
  0x1c   : > { %s599_s22 = scalar_lea.hbm %s598_s28, 16  ;;  %s604_s4 = scalar_lea.hbm %s931_s0, 32 }
  0x1d   : > { %p600_p5 = scmp.ne.s32.totalorder %s598_s28, %s599_s22  ;;  %p605_p1 = scmp.lt.s32.totalorder %s598_s28, %s931_s0 }
  0x1e   : > { %p606_p2 = scmp.lt.s32.totalorder %s604_s4, %s599_s22 }
  0x1f   : > { %p602_p9 = pnand %p601_p8, %p600_p5 }
  0x20   : > { %p607_p3 = por %p606_p2, %p605_p1 }
  0x21   : > { %p603_p10 = pneg %p602_p9 }
  0x23   : > { %p608_p0 = pnand %p607_p3, %p603_p10 }
  0x25   : > { %611 = shalt.err (!%p608_p0)
}
  0x26   : > { %s732_s5 = smov 64   ;;  %s733_s7 = smov 4  }
  0x27   : > { %510 = dma.hbm_to_vmem [thread:$0]  (!%p837_p7), %s164_s17, 256, %s166_s20, %s154_s27, %s732_s5, %s732_s5, %s733_s7  }
  0x28   : > { %177 = sbr.rel (%p821_p13) target bundleno = 517 (0x205), region = 28  ;;  %s858_s10 = sand.u32 (!%p821_p13), 1, %s721_s13  }
  0x29   : > { %s482_s11 = sshll.u32 (!%p821_p13), %s858_s10, 4  ;;  %s180_s19 = scalar_lea.sflag (!%p821_p13), [#allocation3], %s858_s10 }
  0x2a   : > { %s183_s28 = scalar_lea.vmem (!%p821_p13), [#allocation2], %s482_s11 }
  0x2d   : > { %700 = dma.done.wait (%p806_p6), %s180_s19, 256  }
  0x2e   : > { %702 = vsyncadd (%p806_p6), %s180_s19, 4294967040 }
  0x2f   : > { %704 = dma.done.wait (%p45_p4), [#allocation6], 64  }
  0x30   : > { %706 = vsyncadd (%p45_p4), [#allocation6], 4294967232  ;;  %v734_v0 = vmov 1983009808   ;;  %v217_v2 = vld [vmem:[%s183_s28] sm:$0xf] }
  0x31   : > { %v225_v1 = vunpack.c.l.s4 %v734_v0  ;;  %v219_v3 = vld [vmem:[%s183_s28 + $0x8] sm:$0xf]  ;;  %v218_v4 = vld [vmem:[%s183_s28 + $0x4] sm:$0xf]  ;;  %v220_v5 = vld [vmem:[%s183_s28 + $0xc] sm:$0xf] }
  0x32   : > { %v221_v6 = vrot.slane %v219_v3, 4  ;;  %vm222_vm0 = vcmask 1047556   ;;  %v228_v8 = vrot.slane %v220_v5, 4  ;;  %v735_v9 = vmov 1934713408   ;;  %s736_s23 = smov 12  }
  0x33   : > { %v226_v7 = vunpack.c.0.s8 %v225_v1  ;;  %v239_v10 = vunpack.c.l.s4 %v735_v9  ;;  %s737_s26 = smov 4   ;;  %s738_s6 = smov 8   ;;  %v269_v26 = vld [vmem:[#allocation5] sm:$0xf]  ;;  %vm290_vm1 = vcmask 1041408   ;;  %vm262_vm2 = vcmask 31744  }
  0x34   : > { %v223_v11 = vsel %vm222_vm0, %v221_v6, %v217_v2  ;;  %v229_v13 = vsel %vm222_vm0, %v228_v8, %v218_v4  ;;  %v270_v27 = vpack.c.bf16 %v269_v26, %v269_v26  ;;  %vm264_vm3 = vcmask 64512   ;;  %s492_s17 = sshll.u32 %s782_s16, 4  ;;  %s209_s20 = scalar_lea.vmem [#allocation7], %s482_s11 }
  0x35   : > { %v227_v12 = vperm.slane %v223_v11, %v226_v7  ;;  %v233_v14 = vperm.slane %v229_v13, %v226_v7  ;;  %v240_v15 = vunpack.c.0.s8 %v239_v10  ;;  %vm266_vm4 = vcmask 97280   ;;  %s346_s29 = scalar_lea.hbm %s933_s2, %s492_s17  ;;  %s347_s30 = sshll.u32 %s209_s20, 4  ;;  %s348_s30 = int_to_ptr.vmem [resolvable:$true] %s347_s30 }
  0x36   : > { %v292_v28 = vsel %vm290_vm1, %v270_v27, 0  ;;  %v739_v37 = vmov 16.0   ;;  %vm308_vm5 = vcmask 261120   ;;  %s349_s4 = sshll.u32 %s346_s29, 4  ;;  %s331_s9 = scalar_lea.sflag [#allocation4], %s858_s10  ;;  %s350_s4 = int_to_ptr.hbm [resolvable:$true] %s349_s4 }
  0x37   : > { %v236_v16 = vrot.slane %v227_v12, 4  ;;  %v234_v17 = vrot.slane %v233_v14, 4  ;;  %301 = vmatpush.bf16.msra.mxu0 %v292_v28  ;;  %565 = vrcp.f32 %v739_v37  ;;  %s641_s8 = sshra.s32 %s350_s4, 4  ;;  %s647_s19 = scalar_lea.hbm %s933_s2, 32  ;;  %s642_s8 = int_to_ptr.hbm [resolvable:$true] %s641_s8 }
  0x38   : > { %s643_s5 = scalar_lea.hbm %s642_s8, 16  ;;  %p648_p0 = scmp.lt.s32.totalorder %s642_s8, %s933_s2 }
  0x39   : > { %v237_v18 = vsel %vm222_vm0, %v233_v14, %v236_v16  ;;  %v235_v19 = vsel %vm222_vm0, %v234_v17, %v227_v12  ;;  %p644_p4 = scmp.ne.s32.totalorder %s642_s8, %s643_s5  ;;  %p649_p7 = scmp.lt.s32.totalorder %s647_s19, %s643_s5 }
  0x3a   : > { %v245_v20 = vperm.slane %v237_v18, %v240_v15  ;;  %v241_v21 = vperm.slane %v235_v19, %v240_v15 }
  0x3b   : > { %p645_p6 = pnand %p644_p4, %p813_p11  ;;  %p650_p5 = por %p649_p7, %p648_p0 }
  0x3c   : > { %v248_v22 = vrot.slane %v245_v20, 4  ;;  %v246_v23 = vrot.slane %v241_v21, 4 }
  0x3d   : > { %v566_v39 = vpop.eup %565  ;;  %p646_p13 = pneg %p645_p6 }
  0x3e   : > { %v249_v24 = vsel %vm222_vm0, 0.0, %v248_v22  ;;  %v247_v25 = vsel %vm222_vm0, 0.0, %v246_v23  ;;  %v321_v40 = vmul.f32 16.0, %v566_v39 }
  0x3f   : > { %259 = vrot.lane.b32.xlu1 %v249_v24, %s736_s23  ;;  %251 = vrot.lane.b32.xlu0 %v247_v25, %s737_s26  ;;  %p651_p8 = pnand %p650_p5, %p646_p13 }
  0x40   : > { %v322_v44 = vsub.f32 1.0, %v321_v40 }
  0x47   : > { %255 = vrot.lane.b32.xlu0 %v245_v20, %s738_s6 }
  0xb1   : > { %v252_v29 = vpop.permute.xlu0 %251  ;;  %v260_v30 = vpop.permute.xlu1 %259 }
  0xb2   : > { %v263_v31 = vsel %vm262_vm2, %v241_v21, %v252_v29 }
  0xb9   : > { %v256_v32 = vpop.permute.xlu0 %255 }
  0xba   : > { %v265_v33 = vsel %vm264_vm3, %v263_v31, %v256_v32 }
  0xbb   : > { %v267_v34 = vsel %vm266_vm4, %v265_v33, %v260_v30 }
  0xbc   : > { %v268_v35 = vpack.c.bf16 %v267_v34, %v267_v34 }
  0xbe   : > { %271 = vxpose.xlu1.c.b16.start.end [1/1] (short) (narrow) %v268_v35, 16 }
 0x16a   : > { %v279_v36 = vpop.trf.xlu1 }
 0x16b   : > { %485 = vmatmul.msk.bf16.vlgmr.msra.gmra.mxu0 %vm262_vm2, %v279_v36 }
 0x1e8   : > { %v303_v38 = vpop.f32.mrf.mxu0 }
 0x1e9   : > { %309 = vst.msk [vmem:[%s209_s20] sm:$0xff] %vm308_vm5, %v303_v38  ;;  %v311_v42 = vsel %vm308_vm5, %v303_v38, 0.0 }
 0x1f0   : > { %v305_v41 = vpop.f32.mrf.mxu0 }
 0x1f1   : > { %310 = vst.msk [vmem:[%s209_s20 + $0x8] sm:$0xff] %vm308_vm5, %v305_v41  ;;  %v312_v43 = vsel %vm308_vm5, %v305_v41, 0.0 }
 0x1f2   : > { %v313_v45 = vadd.f32 %v312_v43, %v311_v42 }
 0x1f3   : > { %654 = shalt.err (!%p651_p8)
}
 0x1f4   : > { %s740_s26 = smov 128   ;;  %v314_v46 = vrot.slane %v313_v45, 4  ;;  %v323_v47 = vmul.f32 %v566_v39, %v322_v44  ;;  %vm325_vm6 = vweird.f32 %v566_v39  ;;  %s361_s27 = scalar_lea.hbm %s934_s3, %s782_s16  ;;  %vm328_vm7 = vcmask 253952  }
 0x1f5   : > { %499 = dma.vmem_to_hbm [thread:$0]  (%p813_p11), %s348_s30, 256, %s350_s4, %s331_s9, %s740_s26, %s740_s26, %s738_s6  }
 0x1f6   : > { %v315_v48 = vadd.f32 %v314_v46, %v313_v45  ;;  %v324_v50 = vadd.f32 %v566_v39, %v323_v47  ;;  %s215_s22 = scalar_lea.vmem [#allocation8], %s858_s10  ;;  %s365_s8 = sshll.u32 %s361_s27, 4  ;;  %s366_s8 = int_to_ptr.hbm [resolvable:$true] %s365_s8 }
 0x1f7   : > { %s363_s29 = sshll.u32 %s215_s22, 4  ;;  %s336_s6 = scalar_lea.sflag [#allocation9], %s858_s10  ;;  %s364_s29 = int_to_ptr.vmem [resolvable:$true] %s363_s29 }
 0x1f8   : > { %v316_v49 = vrot.slane %v315_v48, 2  ;;  %v326_v53 = vsel %vm325_vm6, %v566_v39, %v324_v50  ;;  %s669_s30 = sshra.s32 %s366_s8, 4  ;;  %s675_s5 = scalar_lea.hbm %s934_s3, 2  ;;  %s670_s30 = int_to_ptr.hbm [resolvable:$true] %s669_s30 }
 0x1f9   : > { %s671_s4 = scalar_lea.hbm %s670_s30, 1  ;;  %p676_p2 = scmp.lt.s32.totalorder %s670_s30, %s934_s3 }
 0x1fa   : > { %v317_v51 = vadd.f32 %v316_v49, %v315_v48  ;;  %p672_p9 = scmp.ne.s32.totalorder %s670_s30, %s671_s4  ;;  %p677_p3 = scmp.lt.s32.totalorder %s675_s5, %s671_s4 }
 0x1fc   : > { %v318_v52 = vrot.slane %v317_v51, 1  ;;  %p673_p10 = pnand %p672_p9, %p813_p11  ;;  %p678_p4 = por %p677_p3, %p676_p2 }
 0x1fe   : > { %v319_v54 = vadd.f32 %v318_v52, %v317_v51  ;;  %p674_p1 = pneg %p673_p10 }
 0x200   : > { %v327_v55 = vmul.f32 %v326_v53, %v319_v54  ;;  %p679_p6 = pnand %p678_p4, %p674_p1 }
 0x202   : > { %329 = vst.msk [vmem:[%s215_s22] sm:$0x1] %vm328_vm7, %v327_v55 }
 0x203   : > { %682 = shalt.err (!%p679_p6)
}
 0x204   : > { %500 = dma.vmem_to_hbm [thread:$0]  (%p813_p11), %s364_s29, 16, %s366_s8, %s336_s6  }
 0x205 PF: > { %s377_s10 = sand.u32 1, %s717_s12   ;;  %p941_p13 = scmp.ge.s32.totalorder %s729_s15, 2 }
 0x206   : > { %s378_s19 = scalar_lea.sflag [#allocation4], %s377_s10 }
 0x207   : > { %p512_p0 = pnand %p941_p13, %p817_p12 }
 0x209   : > { %p513_p7 = pneg %p512_p0 }
 0x20b   : > { %708 = dma.done.wait (%p513_p7), %s378_s19, 256  }
 0x20c   : > { %710 = vsyncadd (%p513_p7), %s378_s19, 4294967040  ;;  %s388_s28 = scalar_lea.sflag [#allocation9], %s377_s10 }
 0x20d   : > { %712 = dma.done.wait (%p513_p7), %s388_s28, 16  }
 0x20e   : > { %714 = vsyncadd (%p513_p7), %s388_s28, 4294967280  ;;  %p21_p11 = scmp.ge.s32.totalorder %s786_s18, 4   ;;  %s942_s12 = smov %s721_s13 }
 0x20f   : > { %s943_s13 = smov %s725_s14  ;;  %s944_s14 = smov %s798_s21 }
 0x210   : > { %s945_s15 = smov %s786_s18  ;;  %23 = sbr.rel (!%p21_p11) target bundleno = 8 (0x8), region = 94 }
 0x215   :  { %393 = vsyncpa [#allocation3], 1 }
 0x216   :  { %395 = vsyncpa [#allocation3 + $0x1], 1 }
 0x217   :  { %396 = vsyncpa [#allocation6], 1 }
 0x218   :  { %397 = vsyncpa [#allocation4], 1 }
 0x219   :  { %399 = vsyncpa [#allocation4 + $0x1], 1 }
 0x21a   :  { %400 = vsyncpa [#allocation9], 1 }
 0x21b   :  { %402 = vsyncpa [#allocation9 + $0x1], 1 }

</bundles_post_ra>
